<compile_context>
chip_gen: v5e
topology: v5e:2x2
jax: 0.10.0
libtpu: 0.0.40
codegen_flags: <defaults>
</compile_context>

<pallas_src>
import functools

import jax
import jax.numpy as jnp
from jax.experimental import pallas as pl
from jax.experimental.pallas import tpu as pltpu


def _ce_rows_kernel(logits_ref, labels_ref, loss_ref):
    """Per-row cross-entropy for one (TN, C) tile of logits.

    logits_ref: (TN, C) input dtype (f32 or bf16)
    labels_ref: (TN, 1) int32
    loss_ref:   (TN, 1) float32 per-example loss
    """
    logits = logits_ref[...].astype(jnp.float32)                  # (TN, C)
    labels = labels_ref[...]                                      # (TN, 1)
    tn, c = logits.shape

    # numerically stable log-sum-exp per row
    row_max = jnp.max(logits, axis=-1, keepdims=True)             # (TN, 1)
    sum_exp = jnp.sum(jnp.exp(logits - row_max), axis=-1, keepdims=True)

    # gather the target logit from the RAW (upcast) logits so `shifted` is
    # consumed only by exp (shorter live range / one fewer full-size temp)
    col_ids = jax.lax.broadcasted_iota(jnp.int32, (tn, c), 1)     # (TN, C)
    target = jnp.sum(jnp.where(col_ids == labels, logits, 0.0),
                     axis=-1, keepdims=True)                      # (TN, 1)

    # CE = logsumexp - target = row_max + log(sum_exp) - target
    loss_ref[...] = row_max + jnp.log(sum_exp) - target           # (TN, 1)


def _round_up(x, m):
    return ((x + m - 1) // m) * m


def _vmem_capacity_bytes():
    """Per-core VMEM capacity; conservative fallback if the query is missing."""
    get_info = getattr(pltpu, "get_tpu_info", None)
    if get_info is not None:
        try:
            return int(get_info().vmem_capacity_bytes)
        except Exception:
            pass
    return 64 * 1024 * 1024   # v7x per-TC size: safe lower bound for all gens


def pl_loss(logits, labels, *, vmem_budget_bytes=None):
    """Mean cross-entropy, equivalent to F.cross_entropy(logits, labels).

    logits: (N, C) float array (f32 or bf16)
    labels: (N,)   integer array of class indices in [0, C)
    returns: scalar float32
    """
    n, c = logits.shape
    in_dtype = logits.dtype
    itemsize = jnp.dtype(in_dtype).itemsize

    # sublane multiple for the input dtype (f32: 8, bf16: 16, 8-bit: 32)
    sub = {4: 8, 2: 16, 1: 32}.get(itemsize, 8)

    vmem_cap = _vmem_capacity_bytes()
    if vmem_budget_bytes is None:
        # total working-set budget: about half the per-core VMEM, minus slack
        # (v7x 64 MiB/TC -> ~28 MiB; v5e/v6e 128 MiB -> 48 MiB)
        vmem_budget_bytes = min(vmem_cap // 2 - (4 << 20), 48 << 20)
    vmem_budget_bytes = max(0, min(int(vmem_budget_bytes), vmem_cap * 7 // 10))

    # Per-row VMEM cost:
    #   double-buffered logits block (lane-padded width in VMEM)
    #   ~3 full-size f32 temporaries (upcast, shifted/exp, iota/select)
    #   lane-padded (TN,1) label + per-row-loss blocks (double-buffered)
    c_lane = _round_up(c, 128)
    row_bytes = (2 * c_lane * itemsize
                 + 3 * c_lane * 4
                 + 2 * 128 * 4
                 + 2 * 128 * 4)

    tn = (vmem_budget_bytes // row_bytes) // sub * sub
    tn = int(min(tn, 8192))
    # >=2 tiles whenever the batch allows it, so ("parallel",) shards the grid
    # across both TensorCores on v7x (negligible cost on single-TC v5e/v6e).
    tn = min(tn, _round_up(max((n + 1) // 2, 1), sub))
    tn = min(tn, _round_up(n, sub))
    tn = int(max(sub, tn))
    num_tiles = (n + tn - 1) // tn

    # labels as an (N, 1) int32 column; the (TN, 1) block is tiny in HBM traffic
    labels2d = labels.astype(jnp.int32).reshape(n, 1)

    # Always set the scoped VMEM limit from the computed working set so v5e's
    # 16 MiB default never trips and v7x's 64 MiB/TC is never exceeded.
    total_vmem = tn * row_bytes
    vmem_limit = int(min(max(total_vmem * 5 // 4 + (2 << 20), 16 << 20),
                         vmem_cap * 9 // 10))

    per_example = pl.pallas_call(
        _ce_rows_kernel,
        out_shape=jax.ShapeDtypeStruct((n, 1), jnp.float32),
        grid=(num_tiles,),
        in_specs=[
            # last block dim == full array dim C: legal even when C % 128 != 0
            pl.BlockSpec((tn, c), lambda i: (i, 0)),
            pl.BlockSpec((tn, 1), lambda i: (i, 0)),
        ],
        out_specs=pl.BlockSpec((tn, 1), lambda i: (i, 0)),
        compiler_params=pltpu.CompilerParams(
            dimension_semantics=("parallel",),
            vmem_limit_bytes=vmem_limit,
        ),
        cost_estimate=pl.CostEstimate(
            flops=int(5 * n * c),
            transcendentals=int(n * c),
            bytes_accessed=int(n * c * itemsize + 2 * n * 4),
        ),
    )(logits, labels2d)

    # output is exactly (N, 1): partial tail blocks are masked on writeback,
    # so every row entering the mean is a real example.
    return jnp.mean(per_example)


def _reference_cross_entropy(logits, labels):
    # pure-JAX reference for a sanity check
    logp = jax.nn.log_softmax(logits.astype(jnp.float32), axis=-1)
    return -jnp.mean(jnp.take_along_axis(logp, labels[:, None].astype(jnp.int32),
                                         axis=-1))


if __name__ == "__main__":
    key = jax.random.PRNGKey(0)
    k1, k2, k3, k4, k5, k6 = jax.random.split(key, 6)

    # 1) small aligned f32 case (matches the module's forward: logits (N,C), label (N,))
    n1, c1 = 8, 32
    logits1 = jax.random.normal(k1, (n1, c1), dtype=jnp.float32)
    labels1 = jax.random.randint(k2, (n1,), 0, c1, dtype=jnp.int32)
    loss1 = jax.block_until_ready(jax.jit(pl_loss)(logits1, labels1))
    ref1 = _reference_cross_entropy(logits1, labels1)
    assert jnp.allclose(loss1, ref1, atol=1e-5, rtol=1e-5), (loss1, ref1)

    # 2) unaligned C, batch not a multiple of the row tile, tiny budget forcing
    #    a multi-tile grid with a partial tail block (no padding copies anywhere)
    n2, c2 = 100, 160
    logits2 = jax.random.normal(k3, (n2, c2), dtype=jnp.float32)
    labels2 = jax.random.randint(k4, (n2,), 0, c2, dtype=jnp.int32)
    small = functools.partial(pl_loss, vmem_budget_bytes=200 * 1024)
    loss2 = jax.block_until_ready(jax.jit(small)(logits2, labels2))
    ref2 = _reference_cross_entropy(logits2, labels2)
    assert jnp.allclose(loss2, ref2, atol=1e-5, rtol=1e-5), (loss2, ref2)

    # 3) bf16 logits (halves the dominant HBM stream on v6e/v7x), 2-tile grid
    n3, c3 = 64, 96
    logits3 = jax.random.normal(k5, (n3, c3), dtype=jnp.bfloat16)
    labels3 = jax.random.randint(k6, (n3,), 0, c3, dtype=jnp.int32)
    loss3 = jax.block_until_ready(jax.jit(pl_loss)(logits3, labels3))
    ref3 = _reference_cross_entropy(logits3, labels3)
    assert jnp.allclose(loss3, ref3, atol=1e-4, rtol=1e-4), (loss3, ref3)

    print("KERNEL_OK")
</pallas_src>

<mosaic_0001>
module attributes {stable_mosaic.version = 11 : i64} {
  func.func @_ce_rows_kernel(%arg0: i32, %arg1: memref<8x32xf32, #tpu.memory_space<vmem>>, %arg2: memref<8x1xi32, #tpu.memory_space<vmem>>, %arg3: memref<8x1xf32, #tpu.memory_space<vmem>>) attributes {dimension_semantics = [#tpu.dimension_semantics<parallel>], iteration_bounds = array<i64: 1>, scalar_prefetch = 0 : i64, scratch_operands = 0 : i64, tpu.core_type = #tpu.core_type<tc>, window_params = [{transform_indices = @transform_0, window_bounds = array<i64: 8, 32>}, {transform_indices = @transform_1, window_bounds = array<i64: 8, 1>}, {transform_indices = @transform_2, window_bounds = array<i64: 8, 1>}]} {
    %c0 = arith.constant 0 : index
    %c0_0 = arith.constant 0 : index
    %0 = vector.load %arg1[%c0, %c0_0] : memref<8x32xf32, #tpu.memory_space<vmem>>, vector<8x32xf32>
    %c0_1 = arith.constant 0 : index
    %c0_2 = arith.constant 0 : index
    %1 = vector.load %arg2[%c0_1, %c0_2] : memref<8x1xi32, #tpu.memory_space<vmem>>, vector<8x1xi32>
    %cst = arith.constant dense<0xFF800000> : vector<8xf32>
    %2 = vector.multi_reduction <maximumf>, %0, %cst [1] : vector<8x32xf32> to vector<8xf32>
    %3 = vector.shape_cast %2 : vector<8xf32> to vector<8x1xf32>
    %4 = vector.broadcast %3 : vector<8x1xf32> to vector<8x32xf32>
    %5 = arith.subf %0, %4 : vector<8x32xf32>
    %6 = math.exp %5 : vector<8x32xf32>
    %cst_3 = arith.constant dense<0.000000e+00> : vector<8xf32>
    %7 = vector.multi_reduction <add>, %6, %cst_3 [1] : vector<8x32xf32> to vector<8xf32>
    %8 = vector.shape_cast %7 : vector<8xf32> to vector<8x1xf32>
    %9 = tpu.iota {dimensions = array<i32: 1>} : vector<8x32xi32>
    %10 = vector.broadcast %1 : vector<8x1xi32> to vector<8x32xi32>
    %11 = arith.cmpi eq, %9, %10 : vector<8x32xi32>
    %cst_4 = arith.constant 0.000000e+00 : f32
    %12 = vector.broadcast %cst_4 : f32 to vector<8x32xf32>
    %13 = arith.select %11, %0, %12 : vector<8x32xi1>, vector<8x32xf32>
    %cst_5 = arith.constant dense<0.000000e+00> : vector<8xf32>
    %14 = vector.multi_reduction <add>, %13, %cst_5 [1] : vector<8x32xf32> to vector<8xf32>
    %15 = vector.shape_cast %14 : vector<8xf32> to vector<8x1xf32>
    %16 = math.log %8 : vector<8x1xf32>
    %17 = arith.addf %3, %16 : vector<8x1xf32>
    %18 = arith.subf %17, %15 : vector<8x1xf32>
    %c0_6 = arith.constant 0 : index
    %c0_7 = arith.constant 0 : index
    %19 = vector.load %arg3[%c0_6, %c0_7] : memref<8x1xf32, #tpu.memory_space<vmem>>, vector<8x1xf32>
    tpu.vector_store %arg3[%c0_6, %c0_7], %18 {strides = array<i32>} : memref<8x1xf32, #tpu.memory_space<vmem>>, vector<8x1xf32>,
    return
  }
  func.func @transform_0(%arg0: i32) -> (i32, i32) {
    %c0_i32 = arith.constant 0 : i32
    %c0_i32_0 = arith.constant 0 : i32
    return %arg0, %c0_i32 : i32, i32
  }
  func.func @transform_1(%arg0: i32) -> (i32, i32) {
    %c0_i32 = arith.constant 0 : i32
    %c0_i32_0 = arith.constant 0 : i32
    return %arg0, %c0_i32 : i32, i32
  }
  func.func @transform_2(%arg0: i32) -> (i32, i32) {
    %c0_i32 = arith.constant 0 : i32
    %c0_i32_0 = arith.constant 0 : i32
    return %arg0, %c0_i32 : i32, i32
  }
}

</mosaic_0001>

<bundles_post_ra>
// kernel: pl_loss.1
= control target key start
LH: loop header
LB: loop body
LE: loop exit
PB: predicated region body
PF: predicated region fallthrough
CT: control target
= control target key end

     0   :  { %vm13_vm0 = vcmask 261120   ;;  %v49_v1 = vmov 0   ;;  %v23_v9 = vlaneseq  ;;  %vm37_vm2 = vcmask 7168   ;;  %s77_s0 = inlined_call_operand.vmem [shape: f32[8,32], index: 0, kind: input, shape index: {}]   ;;  %s78_s1 = inlined_call_operand.vmem [shape: s32[8,1], index: 1, kind: input, shape index: {}]   ;;  %s79_s2 = inlined_call_operand.vmem [shape: f32[8,1], index: 2, kind: output, shape index: {}]  }
   0x1   :  { %v11_v0 = vld [vmem:[%s77_s0] sm:$0xff]  ;;  %44 = vset.pattern.permute.xlu0 %v49_v1 }
   0x2   :  { %v14_v2 = vsel %vm13_vm0, %v11_v0, -inf  ;;  %v12_v3 = vld [vmem:[%s78_s1] sm:$0xff]  ;;  %v24_v10 = vand.u32 127, %v23_v9 }
   0x3   :  { %15 = vmax.xlane.f32.xlu0 %v14_v2 }
  0x17   :  { %26 = vperm.xlu0 %44, %v12_v3  }
  0x76   :  { %v16_v4 = vpop.xlane.xlu0 %15 }
  0x77   :  { %v17_v5 = vsub.f32 %v11_v0, %v16_v4 }
  0x79   :  { %v18_v6 = vmul.f32 1.442695, %v17_v5 }
  0x7b   :  { %45 = vpow2.f32 %v18_v6 }
  0x81   :  { %v46_v7 = vpop.eup %45 }
  0x82   :  { %v20_v8 = vsel %vm13_vm0, %v46_v7, 0.0 }
  0x83   :  { %21 = vadd.xlane.f32.xlu1 %v20_v8 }
  0x89   :  { %v27_v11 = vpop.permute.xlu0 %26 }
  0x8a   :  { %vm28_vm1 = vcmp.eq.s32.totalorder %v24_v10, %v27_v11 }
  0x8b   :  { %v29_v12 = vsel %vm28_vm1, %v11_v0, 0.0 }
  0x8c   :  { %v30_v13 = vsel %vm13_vm0, %v29_v12, 0.0 }
  0x8d   :  { %31 = vadd.xlane.f32.xlu1 %v30_v13 }
  0xf6   :  { %v22_v14 = vpop.xlane.xlu1 %21 }
  0xf7   :  { %47 = vlog2.f32 %v22_v14 }
  0xfd   :  { %v48_v15 = vpop.eup %47 }
  0xfe   :  { %v34_v16 = vmul.f32 0.6931472, %v48_v15 }
 0x100   :  { %v35_v17 = vadd.f32 %v34_v16, %v16_v4  ;;  %v32_v18 = vpop.xlane.xlu1 %31 }
 0x102   :  { %v36_v19 = vsub.f32 %v35_v17, %v32_v18 }
 0x104   :  { %38 = vst.msk [vmem:[%s79_s2] sm:$0xff] %vm37_vm2, %v36_v19 }

</bundles_post_ra>
